<compile_context>
chip_gen: v6e
topology: v6e:2x2x1
jax: 0.10.0
libtpu: 0.0.40
codegen_flags: <defaults>
</compile_context>

<pallas_src>
import jax
import jax.numpy as jnp
from jax.experimental import pallas as pl
from jax.experimental.pallas import tpu as pltpu

# ----------------------------------------------------------------------------
# Deterministic stand-ins for the original `config` module / np.load'ed sample
# (synthetic kernel; no files are read).
# ----------------------------------------------------------------------------
BALANCING_WEIGHTS = (1.0, 1.0, 2.0, 5.0, 10.0, 30.0)   # config.balancing_weights
THRESHOLDS_MAG = (0.5, 2.0, 5.0, 10.0)                 # config.THRESHOLDS
MSE_WEIGHT, MAE_WEIGHT = 1.0, 1.0                      # config.mse_mae_weights
NORMAL_LOSS_GLOBAL_SCALE = 0.00005                     # config.normal_loss_global_scale


def mag_to_pixel(mag):
    # Deterministic stand-in for the repo's magnitude -> pixel-value mapping.
    return mag * 255.0 / 80.0


THRESHOLDS_PIXEL = tuple(float(mag_to_pixel(m)) for m in THRESHOLDS_MAG)


def _round_up(x, m):
    return (x + m - 1) // m * m


# ----------------------------------------------------------------------------
# Pallas kernel
# ----------------------------------------------------------------------------
def _wmse_mae_kernel(x_ref, t_ref, a_ref, mse_out, mae_out, mse_acc, mae_acc):
    # Grid = (splits, steps): axis 0 "parallel" (megacore), axis 1 "arbitrary"
    # (reduction over row blocks of this split).
    k = pl.program_id(1)

    @pl.when(k == 0)
    def _init():
        mse_acc[...] = jnp.zeros_like(mse_acc)
        mae_acc[...] = jnp.zeros_like(mae_acc)

    x = x_ref[...]          # (block_rows, HW) f32
    t = t_ref[...]          # (block_rows, HW) f32
    r = a_ref[...]          # (1, HW) f32 area map; broadcasts over rows

    t255 = t * 255.0

    # weights = bw0 + r*(bw1-bw0) + sum_i (bw[i+2]-bw[i+1]) * [t*255 >= th_i]
    w = BALANCING_WEIGHTS[0] + r * (BALANCING_WEIGHTS[1] - BALANCING_WEIGHTS[0])
    for i, th in enumerate(THRESHOLDS_PIXEL):
        delta = float(BALANCING_WEIGHTS[i + 2] - BALANCING_WEIGHTS[i + 1])
        ind = (t255 >= th).astype(jnp.float32)
        if delta == 1.0:          # skip the multiply when the delta is 1.0
            w = w + ind
        else:
            w = w + delta * ind

    ad = jnp.abs(x - t)
    wad = w * ad                   # reused for both MAE and MSE terms
    # Elementwise (VPU-only) partial-sum accumulation; no per-step XLU reduce.
    mae_acc[...] = mae_acc[...] + wad
    mse_acc[...] = mse_acc[...] + wad * ad

    @pl.when(k == pl.num_programs(1) - 1)
    def _finalize():
        # Single cross-lane reduction per split; write the scalar broadcast
        # across a lane-dense (8, 128) output tile.
        tile = jnp.zeros((8, 128), jnp.float32)
        mse_out[0] = tile + jnp.sum(mse_acc[...], keepdims=True)
        mae_out[0] = tile + jnp.sum(mae_acc[...], keepdims=True)


# ----------------------------------------------------------------------------
# Wrapper
# ----------------------------------------------------------------------------
@jax.jit
def weighted_mse_mae(inp, tgt, area):
    """inp, tgt: [B, C, H, W] float32; area: [H, W] float32 (localization sample)."""
    B, C, H, W = inp.shape
    HW = H * W
    R = B * C

    x2 = inp.reshape(R, HW).astype(jnp.float32)
    t2 = tgt.reshape(R, HW).astype(jnp.float32)
    a2 = area.reshape(1, HW).astype(jnp.float32)   # passed once, not tiled over C

    # ---- tiling: large (8,128)-aligned row blocks, ~2 MiB per streamed input ----
    bytes_per_row = HW * 4
    budget = 2 * 1024 * 1024
    block_rows = max(8, (budget // bytes_per_row) // 8 * 8)
    R8 = _round_up(R, 8)
    block_rows = min(block_rows, R8)

    num_blocks = pl.cdiv(R8, block_rows)
    # Leading "parallel" axis so both v7x TensorCores get work (per-split
    # partial outputs -> no shared-accumulator race). Harmless on 1-TC chips.
    num_splits = 2 if num_blocks >= 2 else 1
    R_pad = _round_up(R8, block_rows * num_splits)
    num_blocks = R_pad // block_rows
    steps = num_blocks // num_splits

    if R_pad != R:
        # Zero rows have d = 0, so they contribute exactly 0 to both sums.
        pad = R_pad - R
        x2 = jnp.pad(x2, ((0, pad), (0, 0)))
        t2 = jnp.pad(t2, ((0, pad), (0, 0)))

    # VMEM: 2 streamed inputs x 2 pipeline buffers + 2 full-block accumulators
    # (+ resident area + tiny outputs). Sized to fit every generation's budget
    # (v7x has only 64 MiB physical VMEM).
    block_bytes = block_rows * HW * 4
    vmem_need = 6 * block_bytes + 4 * HW * 4 + 4 * 8 * 128 * 4 + (1 << 20)
    vmem_limit = int(min(max(vmem_need, 16 * 1024 * 1024), 64 * 1024 * 1024))

    mse_parts, mae_parts = pl.pallas_call(
        _wmse_mae_kernel,
        out_shape=(
            jax.ShapeDtypeStruct((num_splits, 8, 128), jnp.float32),
            jax.ShapeDtypeStruct((num_splits, 8, 128), jnp.float32),
        ),
        grid_spec=pltpu.PrefetchScalarGridSpec(
            num_scalar_prefetch=0,
            grid=(num_splits, steps),
            in_specs=[
                pl.BlockSpec((block_rows, HW), lambda s, k: (s * steps + k, 0)),
                pl.BlockSpec((block_rows, HW), lambda s, k: (s * steps + k, 0)),
                pl.BlockSpec((1, HW), lambda s, k: (0, 0)),     # constant area map
            ],
            out_specs=[
                pl.BlockSpec((1, 8, 128), lambda s, k: (s, 0, 0)),
                pl.BlockSpec((1, 8, 128), lambda s, k: (s, 0, 0)),
            ],
            scratch_shapes=[
                pltpu.VMEM((block_rows, HW), jnp.float32),   # MSE partial sums
                pltpu.VMEM((block_rows, HW), jnp.float32),   # MAE partial sums
            ],
        ),
        compiler_params=pltpu.CompilerParams(
            dimension_semantics=("parallel", "arbitrary"),
            vmem_limit_bytes=vmem_limit,
        ),
    )(x2, t2, a2)

    mse_sum = jnp.sum(mse_parts[:, 0, 0])
    mae_sum = jnp.sum(mae_parts[:, 0, 0])
    return NORMAL_LOSS_GLOBAL_SCALE * (
        MSE_WEIGHT * mse_sum / B + MAE_WEIGHT * mae_sum / B
    )


# ----------------------------------------------------------------------------
# Pure-JAX reference (mirrors the PyTorch forward exactly)
# ----------------------------------------------------------------------------
def weighted_mse_mae_ref(inp, tgt, area):
    B, C, H, W = inp.shape
    r = jnp.broadcast_to(area[None, None], (B, C, H, W)).astype(jnp.float32)
    t255 = tgt * 255.0
    w = jnp.full_like(inp, BALANCING_WEIGHTS[0]) + r * (
        BALANCING_WEIGHTS[1] - BALANCING_WEIGHTS[0]
    )
    for i, th in enumerate(THRESHOLDS_PIXEL):
        w = w + (BALANCING_WEIGHTS[i + 2] - BALANCING_WEIGHTS[i + 1]) * (
            t255 >= th
        ).astype(jnp.float32)
    mse = jnp.sum(w * (inp - tgt) ** 2, axis=(1, 2, 3))
    mae = jnp.sum(w * jnp.abs(inp - tgt), axis=(1, 2, 3))
    return NORMAL_LOSS_GLOBAL_SCALE * (
        MSE_WEIGHT * jnp.mean(mse) + MAE_WEIGHT * jnp.mean(mae)
    )


if __name__ == "__main__":
    key = jax.random.PRNGKey(0)
    k1, k2, k3 = jax.random.split(key, 3)
    B, C, H, W = 2, 4, 16, 16
    inp = jax.random.uniform(k1, (B, C, H, W), dtype=jnp.float32)
    tgt = jax.random.uniform(k2, (B, C, H, W), dtype=jnp.float32)
    # Deterministic stand-in for np.load(config.sample)['sequence_array'].
    area = (jax.random.uniform(k3, (H, W), dtype=jnp.float32) > 0.5).astype(
        jnp.float32
    )

    out = jax.block_until_ready(weighted_mse_mae(inp, tgt, area))
    ref = weighted_mse_mae_ref(inp, tgt, area)
    assert jnp.allclose(out, ref, rtol=1e-4, atol=1e-7), (out, ref)
    print("KERNEL_OK")
</pallas_src>

<mosaic_0001>
module attributes {stable_mosaic.version = 11 : i64} {
  func.func @_wmse_mae_kernel(%arg0: i32, %arg1: i32, %arg2: memref<8x256xf32, #tpu.memory_space<vmem>>, %arg3: memref<8x256xf32, #tpu.memory_space<vmem>>, %arg4: memref<1x256xf32, #tpu.memory_space<vmem>>, %arg5: memref<1x8x128xf32, #tpu.memory_space<vmem>>, %arg6: memref<1x8x128xf32, #tpu.memory_space<vmem>>, %arg7: memref<8x256xf32, #tpu.memory_space<vmem>>, %arg8: memref<8x256xf32, #tpu.memory_space<vmem>>) attributes {dimension_semantics = [#tpu.dimension_semantics<parallel>, #tpu.dimension_semantics<arbitrary>], iteration_bounds = array<i64: 1, 1>, scalar_prefetch = 0 : i64, scratch_operands = 2 : i64, tpu.core_type = #tpu.core_type<tc>, window_params = [{transform_indices = @transform_0, window_bounds = array<i64: 8, 256>}, {transform_indices = @transform_1, window_bounds = array<i64: 8, 256>}, {pipeline_mode = #tpu.pipeline_mode<synchronous>, transform_indices = @transform_2, window_bounds = array<i64: 1, 256>}, {transform_indices = @transform_3, window_bounds = array<i64: 1, 8, 128>}, {transform_indices = @transform_4, window_bounds = array<i64: 1, 8, 128>}]} {
    %c0_i32 = arith.constant 0 : i32
    %0 = arith.cmpi eq, %arg1, %c0_i32 : i32
    %1 = arith.extui %0 : i1 to i32
    %c0_i32_0 = arith.constant 0 : i32
    %2 = arith.cmpi ne, %1, %c0_i32_0 : i32
    scf.if %2 {
      %cst_25 = arith.constant 0.000000e+00 : f32
      %52 = vector.broadcast %cst_25 : f32 to vector<8x256xf32>
      %c0_26 = arith.constant 0 : index
      %c0_27 = arith.constant 0 : index
      %53 = vector.load %arg7[%c0_26, %c0_27] : memref<8x256xf32, #tpu.memory_space<vmem>>, vector<8x256xf32>
      tpu.vector_store %arg7[%c0_26, %c0_27], %52 {strides = array<i32>} : memref<8x256xf32, #tpu.memory_space<vmem>>, vector<8x256xf32>,
      %cst_28 = arith.constant 0.000000e+00 : f32
      %54 = vector.broadcast %cst_28 : f32 to vector<8x256xf32>
      %c0_29 = arith.constant 0 : index
      %c0_30 = arith.constant 0 : index
      %55 = vector.load %arg8[%c0_29, %c0_30] : memref<8x256xf32, #tpu.memory_space<vmem>>, vector<8x256xf32>
      tpu.vector_store %arg8[%c0_29, %c0_30], %54 {strides = array<i32>} : memref<8x256xf32, #tpu.memory_space<vmem>>, vector<8x256xf32>,
    } else {
    }
    %c0 = arith.constant 0 : index
    %c0_1 = arith.constant 0 : index
    %3 = vector.load %arg2[%c0, %c0_1] : memref<8x256xf32, #tpu.memory_space<vmem>>, vector<8x256xf32>
    %c0_2 = arith.constant 0 : index
    %c0_3 = arith.constant 0 : index
    %4 = vector.load %arg3[%c0_2, %c0_3] : memref<8x256xf32, #tpu.memory_space<vmem>>, vector<8x256xf32>
    %c0_4 = arith.constant 0 : index
    %c0_5 = arith.constant 0 : index
    %5 = vector.load %arg4[%c0_4, %c0_5] : memref<1x256xf32, #tpu.memory_space<vmem>>, vector<1x256xf32>
    %cst = arith.constant 2.550000e+02 : f32
    %6 = vector.broadcast %cst : f32 to vector<8x256xf32>
    %7 = arith.mulf %4, %6 : vector<8x256xf32>
    %cst_6 = arith.constant 0.000000e+00 : f32
    %8 = vector.broadcast %cst_6 : f32 to vector<1x256xf32>
    %9 = arith.mulf %5, %8 : vector<1x256xf32>
    %cst_7 = arith.constant 1.000000e+00 : f32
    %10 = vector.broadcast %cst_7 : f32 to vector<1x256xf32>
    %11 = arith.addf %10, %9 : vector<1x256xf32>
    %cst_8 = arith.constant 1.593750e+00 : f32
    %12 = vector.broadcast %cst_8 : f32 to vector<8x256xf32>
    %13 = arith.cmpf oge, %7, %12 : vector<8x256xf32>
    %14 = arith.extui %13 : vector<8x256xi1> to vector<8x256xi32>
    %15 = arith.sitofp %14 : vector<8x256xi32> to vector<8x256xf32>
    %16 = vector.broadcast %11 : vector<1x256xf32> to vector<8x256xf32>
    %17 = arith.addf %16, %15 : vector<8x256xf32>
    %cst_9 = arith.constant 6.375000e+00 : f32
    %18 = vector.broadcast %cst_9 : f32 to vector<8x256xf32>
    %19 = arith.cmpf oge, %7, %18 : vector<8x256xf32>
    %20 = arith.extui %19 : vector<8x256xi1> to vector<8x256xi32>
    %21 = arith.sitofp %20 : vector<8x256xi32> to vector<8x256xf32>
    %cst_10 = arith.constant 3.000000e+00 : f32
    %22 = vector.broadcast %cst_10 : f32 to vector<8x256xf32>
    %23 = arith.mulf %22, %21 : vector<8x256xf32>
    %24 = arith.addf %17, %23 : vector<8x256xf32>
    %cst_11 = arith.constant 1.593750e+01 : f32
    %25 = vector.broadcast %cst_11 : f32 to vector<8x256xf32>
    %26 = arith.cmpf oge, %7, %25 : vector<8x256xf32>
    %27 = arith.extui %26 : vector<8x256xi1> to vector<8x256xi32>
    %28 = arith.sitofp %27 : vector<8x256xi32> to vector<8x256xf32>
    %cst_12 = arith.constant 5.000000e+00 : f32
    %29 = vector.broadcast %cst_12 : f32 to vector<8x256xf32>
    %30 = arith.mulf %29, %28 : vector<8x256xf32>
    %31 = arith.addf %24, %30 : vector<8x256xf32>
    %cst_13 = arith.constant 3.187500e+01 : f32
    %32 = vector.broadcast %cst_13 : f32 to vector<8x256xf32>
    %33 = arith.cmpf oge, %7, %32 : vector<8x256xf32>
    %34 = arith.extui %33 : vector<8x256xi1> to vector<8x256xi32>
    %35 = arith.sitofp %34 : vector<8x256xi32> to vector<8x256xf32>
    %cst_14 = arith.constant 2.000000e+01 : f32
    %36 = vector.broadcast %cst_14 : f32 to vector<8x256xf32>
    %37 = arith.mulf %36, %35 : vector<8x256xf32>
    %38 = arith.addf %31, %37 : vector<8x256xf32>
    %39 = arith.subf %3, %4 : vector<8x256xf32>
    %40 = math.absf %39 : vector<8x256xf32>
    %41 = arith.mulf %38, %40 : vector<8x256xf32>
    %c0_15 = arith.constant 0 : index
    %c0_16 = arith.constant 0 : index
    %42 = vector.load %arg8[%c0_15, %c0_16] : memref<8x256xf32, #tpu.memory_space<vmem>>, vector<8x256xf32>
    %43 = arith.addf %42, %41 : vector<8x256xf32>
    %c0_17 = arith.constant 0 : index
    %c0_18 = arith.constant 0 : index
    %44 = vector.load %arg8[%c0_17, %c0_18] : memref<8x256xf32, #tpu.memory_space<vmem>>, vector<8x256xf32>
    tpu.vector_store %arg8[%c0_17, %c0_18], %43 {strides = array<i32>} : memref<8x256xf32, #tpu.memory_space<vmem>>, vector<8x256xf32>,
    %c0_19 = arith.constant 0 : index
    %c0_20 = arith.constant 0 : index
    %45 = vector.load %arg7[%c0_19, %c0_20] : memref<8x256xf32, #tpu.memory_space<vmem>>, vector<8x256xf32>
    %46 = arith.mulf %41, %40 : vector<8x256xf32>
    %47 = arith.addf %45, %46 : vector<8x256xf32>
    %c0_21 = arith.constant 0 : index
    %c0_22 = arith.constant 0 : index
    %48 = vector.load %arg7[%c0_21, %c0_22] : memref<8x256xf32, #tpu.memory_space<vmem>>, vector<8x256xf32>
    tpu.vector_store %arg7[%c0_21, %c0_22], %47 {strides = array<i32>} : memref<8x256xf32, #tpu.memory_space<vmem>>, vector<8x256xf32>,
    %c0_i32_23 = arith.constant 0 : i32
    %49 = arith.cmpi eq, %arg1, %c0_i32_23 : i32
    %50 = arith.extui %49 : i1 to i32
    %c0_i32_24 = arith.constant 0 : i32
    %51 = arith.cmpi ne, %50, %c0_i32_24 : i32
    scf.if %51 {
      %cst_25 = arith.constant 0.000000e+00 : f32
      %52 = vector.broadcast %cst_25 : f32 to vector<8x128xf32>
      %c0_26 = arith.constant 0 : index
      %c0_27 = arith.constant 0 : index
      %53 = vector.load %arg7[%c0_26, %c0_27] : memref<8x256xf32, #tpu.memory_space<vmem>>, vector<8x256xf32>
      %54 = vector.shape_cast %53 : vector<8x256xf32> to vector<1x8x256xf32>
      %cst_28 = arith.constant dense<0.000000e+00> : vector<1xf32>
      %55 = vector.multi_reduction <add>, %54, %cst_28 [1, 2] : vector<1x8x256xf32> to vector<1xf32>
      %56 = vector.shape_cast %55 : vector<1xf32> to vector<1x1x1xf32>
      %57 = vector.extract %56[0, 0, 0] : f32 from vector<1x1x1xf32>
      %58 = vector.broadcast %57 : f32 to vector<1x1xf32>
      %59 = vector.broadcast %58 : vector<1x1xf32> to vector<8x128xf32>
      %60 = arith.addf %52, %59 : vector<8x128xf32>
      %c0_29 = arith.constant 0 : index
      %c0_30 = arith.constant 0 : index
      %c0_31 = arith.constant 0 : index
      %61 = vector.load %arg5[%c0_29, %c0_30, %c0_31] : memref<1x8x128xf32, #tpu.memory_space<vmem>>, vector<1x8x128xf32>
      %62 = vector.shape_cast %61 : vector<1x8x128xf32> to vector<8x128xf32>
      %63 = vector.shape_cast %60 : vector<8x128xf32> to vector<1x8x128xf32>
      tpu.vector_store %arg5[%c0_29, %c0_30, %c0_31], %63 {strides = array<i32>} : memref<1x8x128xf32, #tpu.memory_space<vmem>>, vector<1x8x128xf32>,
      %c0_32 = arith.constant 0 : index
      %c0_33 = arith.constant 0 : index
      %64 = vector.load %arg8[%c0_32, %c0_33] : memref<8x256xf32, #tpu.memory_space<vmem>>, vector<8x256xf32>
      %65 = vector.shape_cast %64 : vector<8x256xf32> to vector<1x8x256xf32>
      %cst_34 = arith.constant dense<0.000000e+00> : vector<1xf32>
      %66 = vector.multi_reduction <add>, %65, %cst_34 [1, 2] : vector<1x8x256xf32> to vector<1xf32>
      %67 = vector.shape_cast %66 : vector<1xf32> to vector<1x1x1xf32>
      %68 = vector.extract %67[0, 0, 0] : f32 from vector<1x1x1xf32>
      %69 = vector.broadcast %68 : f32 to vector<1x1xf32>
      %70 = vector.broadcast %69 : vector<1x1xf32> to vector<8x128xf32>
      %71 = arith.addf %52, %70 : vector<8x128xf32>
      %c0_35 = arith.constant 0 : index
      %c0_36 = arith.constant 0 : index
      %c0_37 = arith.constant 0 : index
      %72 = vector.load %arg6[%c0_35, %c0_36, %c0_37] : memref<1x8x128xf32, #tpu.memory_space<vmem>>, vector<1x8x128xf32>
      %73 = vector.shape_cast %72 : vector<1x8x128xf32> to vector<8x128xf32>
      %74 = vector.shape_cast %71 : vector<8x128xf32> to vector<1x8x128xf32>
      tpu.vector_store %arg6[%c0_35, %c0_36, %c0_37], %74 {strides = array<i32>} : memref<1x8x128xf32, #tpu.memory_space<vmem>>, vector<1x8x128xf32>,
    } else {
    }
    return
  }
  func.func @transform_0(%arg0: i32, %arg1: i32) -> (i32, i32) {
    %c1_i32 = arith.constant 1 : i32
    %0 = arith.muli %arg0, %c1_i32 : i32
    %1 = arith.addi %0, %arg1 : i32
    %c0_i32 = arith.constant 0 : i32
    %c0_i32_0 = arith.constant 0 : i32
    return %1, %c0_i32 : i32, i32
  }
  func.func @transform_1(%arg0: i32, %arg1: i32) -> (i32, i32) {
    %c1_i32 = arith.constant 1 : i32
    %0 = arith.muli %arg0, %c1_i32 : i32
    %1 = arith.addi %0, %arg1 : i32
    %c0_i32 = arith.constant 0 : i32
    %c0_i32_0 = arith.constant 0 : i32
    return %1, %c0_i32 : i32, i32
  }
  func.func @transform_2(%arg0: i32, %arg1: i32) -> (i32, i32) {
    %c0_i32 = arith.constant 0 : i32
    %c0_i32_0 = arith.constant 0 : i32
    %c0_i32_1 = arith.constant 0 : i32
    return %c0_i32, %c0_i32_0 : i32, i32
  }
  func.func @transform_3(%arg0: i32, %arg1: i32) -> (i32, i32, i32) {
    %c0_i32 = arith.constant 0 : i32
    %c0_i32_0 = arith.constant 0 : i32
    %c0_i32_1 = arith.constant 0 : i32
    return %arg0, %c0_i32, %c0_i32_0 : i32, i32, i32
  }
  func.func @transform_4(%arg0: i32, %arg1: i32) -> (i32, i32, i32) {
    %c0_i32 = arith.constant 0 : i32
    %c0_i32_0 = arith.constant 0 : i32
    %c0_i32_1 = arith.constant 0 : i32
    return %arg0, %c0_i32, %c0_i32_0 : i32, i32, i32
  }
}

</mosaic_0001>

<bundles_post_ra>
// kernel: weighted_mse_mae.1
= control target key start
LH: loop header
LB: loop body
LE: loop exit
PB: predicated region body
PF: predicated region fallthrough
CT: control target
= control target key end

     0   :  { %v80_v0 = vlaneseq  ;;  %v208_v15 = vmov 0.0   ;;  %s255_s0 = inlined_call_operand.vmem [shape: f32[8,256], index: 0, kind: input, shape index: {}]   ;;  %s256_s1 = inlined_call_operand.vmem [shape: f32[8,256], index: 1, kind: input, shape index: {}]   ;;  %s257_s2 = inlined_call_operand.vmem [shape: f32[1,256], index: 2, kind: input, shape index: {}]   ;;  %s258_s3 = inlined_call_operand.vmem [shape: f32[1,8,128], index: 3, kind: output, shape index: {0}]   ;;  %s259_s4 = inlined_call_operand.vmem [shape: f32[1,8,128], index: 4, kind: output, shape index: {1}]  }
   0x1   :  { %v64_v1 = vld [vmem:[%s255_s0] sm:$0xff]  ;;  %v65_v2 = vld [vmem:[%s255_s0 + $0x8] sm:$0xff] }
   0x2   :  { %v66_v3 = vld [vmem:[%s256_s1] sm:$0xff]  ;;  %v67_v4 = vld [vmem:[%s256_s1 + $0x8] sm:$0xff]  ;;  %v81_v7 = vshrl.u32 %v80_v0, 7 }
   0x3   :  { %v68_v5 = vld [vmem:[%s257_s2] sm:$0x3]  ;;  %v69_v6 = vmul.f32 255.0, %v66_v3  ;;  %v70_v8 = vmul.f32 255.0, %v67_v4  ;;  %v122_v10 = vsub.f32 %v64_v1, %v66_v3  ;;  %v123_v11 = vsub.f32 %v65_v2, %v67_v4 }
   0x4   :  { %v71_v9 = vmul.f32 0.0, %v68_v5  ;;  %v82_v12 = vsub.s32 0, %v81_v7  ;;  %v86_v13 = vsub.s32 1, %v81_v7 }
   0x5   :  { %vm73_vm0 = vcmp.ge.f32.partialorder %v69_v6, 1.59375  ;;  %vm92_vm1 = vcmp.ge.f32.partialorder %v69_v6, 6.375  ;;  %vm74_vm2 = vcmp.ge.f32.partialorder %v70_v8, 1.59375  ;;  %vm93_vm3 = vcmp.ge.f32.partialorder %v70_v8, 6.375 }
   0x6   :  { %v72_v14 = vadd.f32 1.0, %v71_v9  ;;  %v195_v16 = vsel %vm73_vm0, 1.0, %v208_v15  ;;  %v196_v17 = vsel %vm74_vm2, 1.0, %v208_v15  ;;  %v197_v18 = vsel %vm92_vm1, 1.0, %v208_v15 }
   0x7   :  { %v198_v19 = vsel %vm93_vm3, 1.0, %v208_v15  ;;  %vm102_vm4 = vcmp.ge.f32.partialorder %v69_v6, 15.9375  ;;  %v98_v22 = vmul.f32 3.0, %v197_v18  ;;  %vm103_vm5 = vcmp.ge.f32.partialorder %v70_v8, 15.9375 }
   0x8   :  { %v83_v20 = vrot.slane %v72_v14, %v82_v12  ;;  %v87_v21 = vrot.slane %v72_v14, %v86_v13  ;;  %v99_v23 = vmul.f32 3.0, %v198_v19  ;;  %v199_v24 = vsel %vm102_vm4, 1.0, %v208_v15 }
   0x9   :  { %vm112_vm6 = vcmp.ge.f32.partialorder %v69_v6, 31.875  ;;  %vm113_vm7 = vcmp.ge.f32.partialorder %v70_v8, 31.875  ;;  %v200_v27 = vsel %vm103_vm5, 1.0, %v208_v15  ;;  %v108_v28 = vmul.f32 5.0, %v199_v24 }
   0xa   :  { %v90_v25 = vadd.f32 %v195_v16, %v83_v20  ;;  %v91_v26 = vadd.f32 %v196_v17, %v87_v21  ;;  %v109_v29 = vmul.f32 5.0, %v200_v27  ;;  %v201_v30 = vsel %vm112_vm6, 1.0, %v208_v15 }
   0xb   :  { %v202_v31 = vsel %vm113_vm7, 1.0, %v208_v15  ;;  %v118_v34 = vmul.f32 20.0, %v201_v30  ;;  %v124_v38 = vand.u32 2147483647, %v122_v10  ;;  %v125_v39 = vand.u32 2147483647, %v123_v11 }
   0xc   :  { %v100_v32 = vadd.f32 %v98_v22, %v90_v25  ;;  %v101_v33 = vadd.f32 %v99_v23, %v91_v26  ;;  %v119_v35 = vmul.f32 20.0, %v202_v31 }
   0xe   :  { %v110_v36 = vadd.f32 %v108_v28, %v100_v32  ;;  %v111_v37 = vadd.f32 %v109_v29, %v101_v33 }
  0x10   :  { %v120_v40 = vadd.f32 %v118_v34, %v110_v36  ;;  %v121_v41 = vadd.f32 %v119_v35, %v111_v37 }
  0x12   :  { %v126_v42 = vmul.f32 %v124_v38, %v120_v40  ;;  %v127_v43 = vmul.f32 %v125_v39, %v121_v41 }
  0x14   :  { %v136_v44 = vmul.f32 %v126_v42, %v124_v38  ;;  %v137_v45 = vmul.f32 %v127_v43, %v125_v39  ;;  %v162_v47 = vadd.f32 %v127_v43, %v126_v42 }
  0x16   :  { %v147_v46 = vadd.f32 %v137_v45, %v136_v44 }
  0x18   :  { %148 = vadd.xlane.f32.xlu0 %v147_v46 }
  0x1c   :  { %163 = vadd.xlane.f32.xlu0 %v162_v47 }
  0xa1   :  { %v149_v48 = vpop.xlane.xlu0 %148 }
  0xa2   :  { %v150_v49 = vrot.slane %v149_v48, 4 }
  0xa4   :  { %v151_v50 = vadd.f32 %v150_v49, %v149_v48 }
  0xa5   :  { %v164_v51 = vpop.xlane.xlu0 %163 }
  0xa6   :  { %v152_v52 = vrot.slane %v151_v50, 2  ;;  %v165_v53 = vrot.slane %v164_v51, 4 }
  0xa8   :  { %v166_v54 = vadd.f32 %v165_v53, %v164_v51  ;;  %v153_v55 = vadd.f32 %v152_v52, %v151_v50 }
  0xaa   :  { %v167_v56 = vrot.slane %v166_v54, 2  ;;  %v154_v57 = vrot.slane %v153_v55, 1 }
  0xac   :  { %v168_v58 = vadd.f32 %v167_v56, %v166_v54  ;;  %v155_v59 = vadd.f32 %v154_v57, %v153_v55 }
  0xae   :  { %203 = vpush %v155_v59  ;;  %v169_v60 = vrot.slane %v168_v58, 1 }
  0xb0   :  { %v170_v61 = vadd.f32 %v169_v60, %v168_v58 }
  0xb2   :  { %205 = vpush %v170_v61 }
  0xdf   :  { %s204_s0 = spop %203 }
  0xe0   :  { %v157_v62 = vstv %s204_s0 }
  0xe1   :  { %159 = vst [vmem:[%s258_s3] sm:$0xff] %v157_v62 }
  0xe3   :  { %s206_s25 = spop %205 }
  0xe4   :  { %v172_v63 = vstv %s206_s25 }
  0xe5   :  { %174 = vst [vmem:[%s259_s4] sm:$0xff] %v172_v63 }

</bundles_post_ra>
